<compile_context>
chip_gen: v6e
topology: v6e:2x2x1
jax: 0.10.0
libtpu: 0.0.40
codegen_flags: <defaults>
</compile_context>

<pallas_src>
import jax
import jax.numpy as jnp
from jax.experimental import pallas as pl
from jax.experimental.pallas import tpu as pltpu


def _normalization_kernel(x_ref, scale_ref, bias_ref, out_ref):
    # x_ref:     (TILE_R, TILE_L) VMEM tile of the flattened image
    # scale_ref: (TILE_R, 1) f32  per-row (== per-channel) 1/std
    # bias_ref:  (TILE_R, 1) f32  per-row -mean/std
    # f32 fused multiply-add; (TILE_R, 1) splats across lanes for free.
    x = x_ref[...].astype(jnp.float32)
    out_ref[...] = (x * scale_ref[...] + bias_ref[...]).astype(out_ref.dtype)


def _round_up(x, m):
    return ((x + m - 1) // m) * m


def _select_tiles(r, l, itemsize):
    """Pick (tile_r, tile_l) for the flattened (r, l) image.

    Lane tile is 128-aligned, row tile is aligned to the packed-sublane
    granule for the dtype. Blocks are capped at ~4 MiB; full rows are
    preferred (contiguous HBM chunks) when they fit the budget.
    """
    lane_align = 128
    sub_align = max(8, 32 // itemsize)      # 8 (f32), 16 (bf16), 32 (int8/fp8)
    target_bytes = 4 * 1024 * 1024          # ~4 MiB per block

    l_pad = _round_up(l, lane_align)
    r_pad = _round_up(r, sub_align)

    row_bytes = l_pad * itemsize
    if row_bytes <= target_bytes:
        # Full-row, HBM-contiguous blocks.
        tile_l = l_pad
        rows = (target_bytes // row_bytes) // sub_align * sub_align
        tile_r = min(r_pad, max(sub_align, rows))
    else:
        # A single row blows the budget: lane-tile it instead.
        tile_r = sub_align
        lanes = (target_bytes // (sub_align * itemsize)) // lane_align * lane_align
        tile_l = min(l_pad, max(lane_align, lanes))

    # v7x megacore: make sure there are >= 2 blocks along a "parallel" axis
    # whenever the tensor allows it (no effect on single-TC v5e/v6e).
    grid_blocks = pl.cdiv(r, tile_r) * pl.cdiv(l, tile_l)
    if grid_blocks < 2:
        if tile_l >= 2 * lane_align:
            tile_l = _round_up(tile_l // 2, lane_align)
        elif tile_r >= 2 * sub_align:
            tile_r = _round_up(tile_r // 2, sub_align)

    return tile_r, tile_l


def normalization(img, mean, std):
    """img: (N, C, H, W); mean, std: (C,). Returns (img - mean) / std with
    per-channel broadcasting, same as the PyTorch module."""
    n, c, h, w = img.shape
    r, l = n * c, h * w

    # Fold (x - mean)/std into x*scale + bias; keep the columns in f32.
    mean_f = jnp.asarray(mean, dtype=jnp.float32)
    std_f = jnp.asarray(std, dtype=jnp.float32)
    scale = 1.0 / std_f
    bias = -mean_f / std_f

    # Row r of the flattened (N*C, H*W) array belongs to channel r % C.
    ch = jnp.tile(jnp.arange(c, dtype=jnp.int32), n)   # (R,)
    scale_col = scale[ch][:, None]                      # (R, 1) f32
    bias_col = bias[ch][:, None]                        # (R, 1) f32

    x2d = img.reshape(r, l)

    itemsize = jnp.dtype(img.dtype).itemsize
    tile_r, tile_l = _select_tiles(r, l, itemsize)
    grid = (pl.cdiv(r, tile_r), pl.cdiv(l, tile_l))

    out2d = pl.pallas_call(
        _normalization_kernel,
        out_shape=jax.ShapeDtypeStruct((r, l), img.dtype),
        grid_spec=pltpu.PrefetchScalarGridSpec(
            num_scalar_prefetch=0,
            grid=grid,
            in_specs=[
                pl.BlockSpec((tile_r, tile_l), lambda i, j: (i, j)),
                # Row tiles are the OUTER grid axis: (i, 0) is constant across
                # the inner lane loop, so these tiny columns are not re-DMA'd.
                pl.BlockSpec((tile_r, 1), lambda i, j: (i, 0)),
                pl.BlockSpec((tile_r, 1), lambda i, j: (i, 0)),
            ],
            out_specs=pl.BlockSpec((tile_r, tile_l), lambda i, j: (i, j)),
        ),
        compiler_params=pltpu.CompilerParams(
            dimension_semantics=("parallel", "parallel"),
            vmem_limit_bytes=32 * 1024 * 1024,
        ),
    )(x2d, scale_col, bias_col)

    return out2d.reshape(n, c, h, w)


if __name__ == "__main__":
    key = jax.random.PRNGKey(0)

    # Small deterministic example consistent with the module's usage
    # (ImageNet-style per-channel normalization constants, 3 channels).
    N, C, H, W = 2, 3, 16, 16
    img = jax.random.uniform(key, (N, C, H, W), dtype=jnp.float32)
    mean = jnp.array([0.485, 0.456, 0.406], dtype=jnp.float32)
    std = jnp.array([0.229, 0.224, 0.225], dtype=jnp.float32)

    out = normalization(img, mean, std)
    out = jax.block_until_ready(out)

    # Pure-JAX reference (same broadcasting semantics as PyTorch).
    # x*(1/std) + (-mean/std) rounds slightly differently than (x-mean)/std.
    ref = (img - mean.reshape(1, C, 1, 1)) / std.reshape(1, C, 1, 1)
    assert out.shape == (N, C, H, W)
    assert jnp.allclose(out, ref, atol=1e-5, rtol=1e-5)

    print("KERNEL_OK")
</pallas_src>

<mosaic_0001>
module attributes {stable_mosaic.version = 11 : i64} {
  func.func @_normalization_kernel(%arg0: i32, %arg1: i32, %arg2: memref<8x128xf32, #tpu.memory_space<vmem>>, %arg3: memref<8x1xf32, #tpu.memory_space<vmem>>, %arg4: memref<8x1xf32, #tpu.memory_space<vmem>>, %arg5: memref<8x128xf32, #tpu.memory_space<vmem>>) attributes {dimension_semantics = [#tpu.dimension_semantics<parallel>, #tpu.dimension_semantics<parallel>], iteration_bounds = array<i64: 1, 2>, scalar_prefetch = 0 : i64, scratch_operands = 0 : i64, tpu.core_type = #tpu.core_type<tc>, window_params = [{transform_indices = @transform_0, window_bounds = array<i64: 8, 128>}, {transform_indices = @transform_1, window_bounds = array<i64: 8, 1>}, {transform_indices = @transform_2, window_bounds = array<i64: 8, 1>}, {transform_indices = @transform_3, window_bounds = array<i64: 8, 128>}]} {
    %c0 = arith.constant 0 : index
    %c0_0 = arith.constant 0 : index
    %0 = vector.load %arg2[%c0, %c0_0] : memref<8x128xf32, #tpu.memory_space<vmem>>, vector<8x128xf32>
    %c0_1 = arith.constant 0 : index
    %c0_2 = arith.constant 0 : index
    %1 = vector.load %arg3[%c0_1, %c0_2] : memref<8x1xf32, #tpu.memory_space<vmem>>, vector<8x1xf32>
    %2 = vector.broadcast %1 : vector<8x1xf32> to vector<8x128xf32>
    %3 = arith.mulf %0, %2 : vector<8x128xf32>
    %c0_3 = arith.constant 0 : index
    %c0_4 = arith.constant 0 : index
    %4 = vector.load %arg4[%c0_3, %c0_4] : memref<8x1xf32, #tpu.memory_space<vmem>>, vector<8x1xf32>
    %5 = vector.broadcast %4 : vector<8x1xf32> to vector<8x128xf32>
    %6 = arith.addf %3, %5 : vector<8x128xf32>
    %c0_5 = arith.constant 0 : index
    %c0_6 = arith.constant 0 : index
    %7 = vector.load %arg5[%c0_5, %c0_6] : memref<8x128xf32, #tpu.memory_space<vmem>>, vector<8x128xf32>
    tpu.vector_store %arg5[%c0_5, %c0_6], %6 {strides = array<i32>} : memref<8x128xf32, #tpu.memory_space<vmem>>, vector<8x128xf32>,
    return
  }
  func.func @transform_0(%arg0: i32, %arg1: i32) -> (i32, i32) {
    %c0_i32 = arith.constant 0 : i32
    return %arg0, %arg1 : i32, i32
  }
  func.func @transform_1(%arg0: i32, %arg1: i32) -> (i32, i32) {
    %c0_i32 = arith.constant 0 : i32
    %c0_i32_0 = arith.constant 0 : i32
    return %arg0, %c0_i32 : i32, i32
  }
  func.func @transform_2(%arg0: i32, %arg1: i32) -> (i32, i32) {
    %c0_i32 = arith.constant 0 : i32
    %c0_i32_0 = arith.constant 0 : i32
    return %arg0, %c0_i32 : i32, i32
  }
  func.func @transform_3(%arg0: i32, %arg1: i32) -> (i32, i32) {
    %c0_i32 = arith.constant 0 : i32
    return %arg0, %arg1 : i32, i32
  }
}

</mosaic_0001>

<bundles_post_ra>
// kernel: tpu_custom_call.1
= control target key start
LH: loop header
LB: loop body
LE: loop exit
PB: predicated region body
PF: predicated region fallthrough
CT: control target
= control target key end

     0   :  { %8 = vsyncpa [#allocation3], 0  ;;  %s640_s0 = inlined_call_operand.vmem [shape: f32[6,256], index: 0, kind: input, shape index: {}]   ;;  %s641_s1 = inlined_call_operand.vmem [shape: f32[6,1], index: 1, kind: input, shape index: {}]   ;;  %s642_s2 = inlined_call_operand.vmem [shape: f32[6,1], index: 2, kind: input, shape index: {}]   ;;  %s643_s3 = inlined_call_operand.hbm [shape: f32[6,256], index: 3, kind: output, shape index: {}]  }
   0x1   :  { %10 = vsyncpa [#allocation3 + $0x1], 0  ;;  %s535_s12 = smov 0   ;;  %s537_s13 = smov 0  }
   0x2   :  { %s539_s14 = smov 0   ;;  %s541_s15 = smov 0  }
   0x3   :  { %s543_s16 = smov 0   ;;  %s545_s17 = smov 0  }
   0x4 LB: > { %s365_s18 = sadd.s32 4294967295, %s511_s17   ;;  %s366_s19 = sadd.s32 4294967294, %s511_s17   ;;  %s511_s17 = sphi %s545_s17, %s16_s17   ;;  %s507_s16 = sphi %s543_s16, %s650_s16   ;;  %s503_s15 = sphi %s541_s15, %s649_s15   ;;  %s499_s14 = sphi %s539_s14, %s648_s14   ;;  %s495_s13 = sphi %s537_s13, %s647_s13   ;;  %s491_s12 = sphi %s535_s12, %s646_s12  }
   0x5   : > { %s25_s20 = sadd.s32 1, %s507_s16  ;;  %s117_s21 = sadd.s32 1, %s499_s14 }
   0x6   : > { %p26_p0 = scmp.ge.s32.totalorder %s25_s20, 2  ;;  %p127_p1 = scmp.ne.s32.totalorder %s499_s14, %s495_s13 }
   0x7   : > { %p128_p2 = scmp.eq.s32.totalorder %s365_s18, 1  ;;  %p133_p3 = scmp.ne.s32.totalorder %s495_s13, %s491_s12 }
   0x8   : > { %s652_s20 = smov (%p26_p0, %s25_s20), 0  ;;  %p134_p5 = scmp.eq.s32.totalorder %s366_s19, 1 }
   0x9   : > { %p575_p4 = por %p128_p2, %p127_p1  ;;  %s113_s23 = ssub.s32 %s507_s16, %s652_s20 }
   0xa   : > { %p371_p6 = scmp.ge.s32.totalorder %s511_s17, 1  ;;  %p115_p7 = scmp.eq.s32.totalorder %s113_s23, 0 }
   0xb   : > { %p582_p8 = por %p134_p5, %p133_p3  ;;  %p177_p9 = scmp.lt.s32.totalorder %s511_s17, 3 }
   0xc   : > { %s588_s25 = scalar_select %p115_p7, %s499_s14, %s117_s21  }
   0xd   : > { %p178_p10 = pnand %p371_p6, %p177_p9 }
   0xe   : > { %p214_p11 = scmp.lt.s32.totalorder (!%p178_p10), %s503_s15, 1  ;;  %s209_s4 = sand.u32 (!%p178_p10), 1, %s495_s13  }
   0xf   : > { %181 = sbr.rel (%p178_p10) target bundleno = 165 (0xa5), region = 32  ;;  %s372_s6 = sshll.u32 (!%p178_p10), %s209_s4, 3 }
  0x10   : > { %s375_s10 = sshll.u32 (!%p178_p10), %s503_s15, 7  ;;  %s211_s11 = scalar_lea.vmem (!%p178_p10), [#allocation2], %s372_s6 }
  0x11   : > { %s260_s18 = sshll.u32 (!%p178_p10), %s211_s11, 4  ;;  %s258_s23 = scalar_lea.hbm (!%p178_p10), %s643_s3, %s375_s10  ;;  %s261_s18 = int_to_ptr.vmem [resolvable:$true] %s260_s18 }
  0x12   : > { %s245_s26 = scalar_lea.sflag (!%p178_p10), [#allocation3], %s209_s4  ;;  %s435_s27 = scalar_lea.vmem (!%p178_p10), %s261_s18, 128 }
  0x13   : > { %p436_p12 = scmp.ne.s32.totalorder (!%p178_p10), %s261_s18, %s435_s27  ;;  %s514_s28 = smov (!%p178_p10), [#allocation2]  }
  0x14   : > { %v229_v0 = vld [vmem:[%s641_s1] sm:$0xff]  ;;  %v513_v1 = vmov 0   ;;  %s215_s30 = scalar_select %p214_p11, %s503_s15, 1 }
  0x15   : > { %434 = vset.pattern.permute.xlu0 %v513_v1  ;;  %v236_v2 = vld [vmem:[%s642_s2] sm:$0xff]  ;;  %p437_p13 = pnand %p436_p12, %p575_p4  ;;  %s439_s29 = sshll.u32 %s514_s28, 4  ;;  %s440_s29 = int_to_ptr.vmem [resolvable:$false] %s439_s29 }
  0x16   : > { %232 = vperm.xlu0 %434, %v229_v0   ;;  %s373_s5 = sshll.u32 %s215_s30, 3  ;;  %s441_s15 = scalar_lea.vmem %s440_s29, 256 }
  0x17   : > { %s219_s9 = scalar_lea.vmem %s640_s0, %s373_s5  ;;  %p438_p0 = pneg %p437_p13 }
  0x18   : > { %v228_v4 = vld [vmem:[%s219_s9] sm:$0xff]  ;;  %p442_p1 = scmp.lt.s32.totalorder %s261_s18, %s440_s29  ;;  %p443_p2 = scmp.lt.s32.totalorder %s441_s15, %s435_s27 }
  0x1a   : > { %239 = vperm.xlu0 %434, %v236_v2   ;;  %p444_p3 = por %p443_p2, %p442_p1 }
  0x1c   : > { %p445_p5 = pnand %p444_p3, %p438_p0 }
  0x91   : > { %v233_v3 = vpop.permute.xlu0 %232 }
  0x92   : > { %v235_v5 = vmul.f32 %v233_v3, %v228_v4 }
  0x95   : > { %v240_v6 = vpop.permute.xlu0 %239 }
  0x96   : > { %v242_v7 = vadd.f32 %v240_v6, %v235_v5 }
  0x98   : > { %243 = vst [vmem:[%s211_s11] sm:$0xff] %v242_v7 }
  0x99   : > { %448 = shalt.err (!%p445_p5)
}
  0x9a   : > { %s449_s30 = scalar_lea.hbm %s258_s23, 128  ;;  %s453_s6 = scalar_lea.hbm %s643_s3, 256 }
  0x9b   : > { %p450_p6 = scmp.ne.s32.totalorder %s258_s23, %s449_s30  ;;  %p454_p10 = scmp.lt.s32.totalorder %s258_s23, %s643_s3 }
  0x9c   : > { %p455_p11 = scmp.lt.s32.totalorder %s453_s6, %s449_s30 }
  0x9d   : > { %p451_p7 = pnand %p450_p6, %p575_p4 }
  0x9e   : > { %p456_p12 = por %p455_p11, %p454_p10 }
  0x9f   : > { %p452_p9 = pneg %p451_p7 }
  0xa1   : > { %p457_p13 = pnand %p456_p12, %p452_p9 }
  0xa3   : > { %460 = shalt.err (!%p457_p13)
}
  0xa4   : > { %378 = dma.vmem_to_hbm [thread:$0]  (%p575_p4), %s261_s18, 128, %s258_s23, %s245_s26  }
  0xa5 PF: > { %p384_p0 = scmp.ge.s32.totalorder %s511_s17, 2  ;;  %s272_s9 = sand.u32 1, %s491_s12  }
  0xa6   : > { %s273_s10 = scalar_lea.sflag [#allocation3], %s272_s9 }
  0xa7   : > { %p381_p1 = pnand %p384_p0, %p582_p8 }
  0xa9   : > { %p382_p2 = pneg %p381_p1 }
  0xab   : > { %486 = dma.done.wait (%p382_p2), %s273_s10, 128  }
  0xac   : > { %488 = vsyncadd (%p382_p2), %s273_s10, 4294967168  ;;  %s16_s17 = sadd.s32 1, %s511_s17   ;;  %s646_s12 = smov %s495_s13 }
  0xad   : > { %p13_p3 = scmp.ge.s32.totalorder %s16_s17, 4   ;;  %s647_s13 = smov %s499_s14 }
  0xae   : > { %s648_s14 = smov %s588_s25  ;;  %s649_s15 = smov %s507_s16 }
  0xaf   : > { %s650_s16 = smov %s652_s20  ;;  %15 = sbr.rel (!%p13_p3) target bundleno = 4 (0x4), region = 73 }
  0xb4   :  { %278 = vsyncpa [#allocation3], 1 }
  0xb5   :  { %280 = vsyncpa [#allocation3 + $0x1], 1 }

</bundles_post_ra>
